<compile_context>
chip_gen: v7x
topology: tpu7x:2x2x1
jax: 0.10.0
libtpu: 0.0.40
codegen_flags: <defaults>
</compile_context>

<pallas_src>
import functools

import jax
import jax.numpy as jnp
import numpy as np
from jax.experimental import pallas as pl
from jax.experimental.pallas import tpu as pltpu


# --------------------------------------------------------------------------- #
# Pallas kernel
# --------------------------------------------------------------------------- #
def _rope_kernel(x_ref, cos_ref, sin_even_ref, sin_odd_ref, o_ref):
    # x_ref: (bn, bs, D) tile; tables: (bs, D), f32.
    x = x_ref[...].astype(jnp.float32)
    cos = cos_ref[...][None, :, :]
    sin_e = sin_even_ref[...][None, :, :]
    sin_o = sin_odd_ref[...][None, :, :]
    d = x.shape[-1]
    # XLU lane rotations: fwd[..., j] = x[..., (j+1) % D], bwd[..., j] = x[..., (j-1) % D]
    fwd = pltpu.roll(x, d - 1, 2)
    bwd = pltpu.roll(x, 1, 2)
    # sin_e = (-s0, 0, -s1, 0, ...), sin_o = (0, +s0, 0, +s1, ...), so:
    #   even lanes: x0*cos - x1*sin ; odd lanes: x1*cos + x0*sin.
    # Wrap-around lanes of fwd/bwd are multiplied by exact zeros.
    out = x * cos + fwd * sin_e + bwd * sin_o
    o_ref[...] = out.astype(o_ref.dtype)


# --------------------------------------------------------------------------- #
# Host-side precomputed tables (cached, mirrors the module's _precompute_freqs_cis)
# --------------------------------------------------------------------------- #
@functools.lru_cache(maxsize=16)
def _rope_tables_np(seq_len, dim, theta):
    inv_freq = 1.0 / (theta ** (np.arange(0, dim, 2, dtype=np.float32) / dim))
    t = np.arange(seq_len, dtype=np.float32)
    freqs = np.outer(t, inv_freq).astype(np.float32)              # (S, D/2)
    cos = np.cos(freqs)
    sin = np.sin(freqs)
    zeros = np.zeros_like(sin)
    cos_full = np.repeat(cos, 2, axis=-1)                                     # [c0, c0, c1, c1, ...]
    sin_even = np.stack([-sin, zeros], axis=-1).reshape(seq_len, dim)         # [-s0, 0, -s1, 0, ...]
    sin_odd = np.stack([zeros, sin], axis=-1).reshape(seq_len, dim)           # [0, +s0, 0, +s1, ...]
    return (cos_full.astype(np.float32),
            sin_even.astype(np.float32),
            sin_odd.astype(np.float32))


# --------------------------------------------------------------------------- #
# Wrapper
# --------------------------------------------------------------------------- #
# Scoped-VMEM cap we are willing to request: safe on v7x (64 MiB physical per TC)
# and trivially safe on v5e / v6e (128 MiB physical).
_VMEM_CAP_BYTES = 48 << 20
_VMEM_FLOOR_BYTES = 16 << 20


def rope_forward(x, theta=10000.0, block_n=16, block_s=512, donate_input=False):
    """Apply rotary positional embedding to x of shape (..., S, D)."""
    # TODO(synk): the module's explicit `seq_len` override and the
    # seq_len > max_seq_len re-precompute path are caching behavior only
    # (numerically identical to the default seq_len = x.shape[-2] path).
    orig_shape = x.shape
    *lead, S, D = x.shape
    assert D % 2 == 0, "RoPE feature dim must be even"
    # TODO(synk): D % 128 != 0 (e.g. head_dim 64/96) still runs correctly but falls
    # into the masked partial-store regime; a lane-dense (B, S, H*D) variant would
    # be needed for full store bandwidth in that case.
    N = int(np.prod(lead)) if lead else 1
    x3 = x.reshape(N, S, D)

    itemsize = jnp.dtype(x.dtype).itemsize
    # Row (sublane) alignment of the S block: 8 for 32-bit, 16 for bf16/f16, 32 for 8-bit.
    row_align = 8 if itemsize >= 4 else (16 if itemsize == 2 else 32)

    # Keep bs = S whenever it fits (fully contiguous x DMA slabs, tables DMA'd once).
    if S <= block_s:
        bs = S
    else:
        bs = max(row_align, (block_s // row_align) * row_align)
    bn = max(1, min(block_n, N))

    # VMEM footprint: double-buffered x + out tiles, plus 3 double-buffered f32 tables.
    def _footprint(bn_):
        tile_bytes = bn_ * bs * D * itemsize
        table_bytes = bs * D * 4
        return 2 * 2 * tile_bytes + 2 * 3 * table_bytes

    margin = 4 << 20  # compiler-internal scratch headroom
    while bn > 1 and _footprint(bn) + margin > _VMEM_CAP_BYTES:
        bn //= 2
    vmem_limit = int(min(max(_footprint(bn) + margin, _VMEM_FLOOR_BYTES), _VMEM_CAP_BYTES))

    cos_np, sin_e_np, sin_o_np = _rope_tables_np(int(S), int(D), float(theta))
    cos_full = jnp.asarray(cos_np)
    sin_even = jnp.asarray(sin_e_np)
    sin_odd = jnp.asarray(sin_o_np)

    # S-blocks outer => table block index constant across all inner (N) steps.
    grid = (pl.cdiv(S, bs), pl.cdiv(N, bn))

    x_bytes = x3.size * itemsize
    table_bytes = 3 * S * D * 4
    cost = pl.CostEstimate(flops=6 * x3.size, transcendentals=0,
                           bytes_accessed=2 * x_bytes + table_bytes)

    # TODO(synk): on v7x, verify via trace that both TensorCores are busy; if not,
    # mark the inner (N) grid axis pltpu.CORE_PARALLEL.
    out = pl.pallas_call(
        _rope_kernel,
        out_shape=jax.ShapeDtypeStruct((N, S, D), x.dtype),
        grid=grid,
        in_specs=[
            pl.BlockSpec((bn, bs, D), lambda s, n: (n, s, 0)),
            pl.BlockSpec((bs, D), lambda s, n: (s, 0)),
            pl.BlockSpec((bs, D), lambda s, n: (s, 0)),
            pl.BlockSpec((bs, D), lambda s, n: (s, 0)),
        ],
        out_specs=pl.BlockSpec((bn, bs, D), lambda s, n: (n, s, 0)),
        compiler_params=pltpu.CompilerParams(
            dimension_semantics=("parallel", "parallel"),
            vmem_limit_bytes=vmem_limit),
        cost_estimate=cost,
        input_output_aliases=({0: 0} if donate_input else {}),
    )(x3, cos_full, sin_even, sin_odd)
    return out.reshape(orig_shape)


# --------------------------------------------------------------------------- #
# Pure-JAX reference mirroring the PyTorch module (for verification)
# --------------------------------------------------------------------------- #
def rope_reference(x, theta=10000.0):
    *lead, S, D = x.shape
    inv_freq = 1.0 / (theta ** (jnp.arange(0, D, 2, dtype=jnp.float32) / D))
    t = jnp.arange(S, dtype=jnp.float32)
    freqs = jnp.outer(t, inv_freq)                      # (S, D/2)
    cos = jnp.cos(freqs)
    sin = jnp.sin(freqs)
    xf = x.astype(jnp.float32).reshape(*lead, S, D // 2, 2)
    x0, x1 = xf[..., 0], xf[..., 1]
    o0 = x0 * cos - x1 * sin
    o1 = x0 * sin + x1 * cos
    out = jnp.stack([o0, o1], axis=-1).reshape(x.shape)
    return out.astype(x.dtype)


# --------------------------------------------------------------------------- #
if __name__ == "__main__":
    # Small shapes consistent with the module's expected (B, H, S, D) input;
    # D = 128 keeps the last dim lane-dense (one full vreg lane width).
    B, H, S, D = 2, 4, 16, 128
    key = jax.random.PRNGKey(0)
    x = jax.random.normal(key, (B, H, S, D), jnp.float32)

    out = jax.jit(rope_forward)(x)
    jax.block_until_ready(out)

    ref = rope_reference(x)
    np.testing.assert_allclose(np.asarray(out), np.asarray(ref), rtol=1e-5, atol=1e-5)

    print("KERNEL_OK")
</pallas_src>

<mosaic_0001>
module attributes {stable_mosaic.version = 11 : i64} {
  func.func @_rope_kernel(%arg0: i32, %arg1: i32, %arg2: memref<8x16x128xf32, #tpu.memory_space<vmem>>, %arg3: memref<16x128xf32, #tpu.memory_space<vmem>>, %arg4: memref<16x128xf32, #tpu.memory_space<vmem>>, %arg5: memref<16x128xf32, #tpu.memory_space<vmem>>, %arg6: memref<8x16x128xf32, #tpu.memory_space<vmem>>) attributes {dimension_semantics = [#tpu.dimension_semantics<parallel>, #tpu.dimension_semantics<parallel>], iteration_bounds = array<i64: 1, 1>, scalar_prefetch = 0 : i64, scratch_operands = 0 : i64, tpu.core_type = #tpu.core_type<tc>, window_params = [{transform_indices = @transform_0, window_bounds = array<i64: 8, 16, 128>}, {transform_indices = @transform_1, window_bounds = array<i64: 16, 128>}, {transform_indices = @transform_2, window_bounds = array<i64: 16, 128>}, {transform_indices = @transform_3, window_bounds = array<i64: 16, 128>}, {transform_indices = @transform_4, window_bounds = array<i64: 8, 16, 128>}]} {
    %c0 = arith.constant 0 : index
    %c0_0 = arith.constant 0 : index
    %c0_1 = arith.constant 0 : index
    %0 = vector.load %arg2[%c0, %c0_0, %c0_1] : memref<8x16x128xf32, #tpu.memory_space<vmem>>, vector<8x16x128xf32>
    %c0_2 = arith.constant 0 : index
    %c0_3 = arith.constant 0 : index
    %1 = vector.load %arg3[%c0_2, %c0_3] : memref<16x128xf32, #tpu.memory_space<vmem>>, vector<16x128xf32>
    %2 = vector.shape_cast %1 : vector<16x128xf32> to vector<1x16x128xf32>
    %c0_4 = arith.constant 0 : index
    %c0_5 = arith.constant 0 : index
    %3 = vector.load %arg4[%c0_4, %c0_5] : memref<16x128xf32, #tpu.memory_space<vmem>>, vector<16x128xf32>
    %4 = vector.shape_cast %3 : vector<16x128xf32> to vector<1x16x128xf32>
    %c0_6 = arith.constant 0 : index
    %c0_7 = arith.constant 0 : index
    %5 = vector.load %arg5[%c0_6, %c0_7] : memref<16x128xf32, #tpu.memory_space<vmem>>, vector<16x128xf32>
    %6 = vector.shape_cast %5 : vector<16x128xf32> to vector<1x16x128xf32>
    %c127_i32 = arith.constant 127 : i32
    %7 = tpu.dynamic_rotate %0 by %c127_i32 dim 2 : vector<8x16x128xf32>, i32 -> vector<8x16x128xf32>
    %c1_i32 = arith.constant 1 : i32
    %8 = tpu.dynamic_rotate %0 by %c1_i32 dim 2 : vector<8x16x128xf32>, i32 -> vector<8x16x128xf32>
    %9 = vector.broadcast %2 : vector<1x16x128xf32> to vector<8x16x128xf32>
    %10 = arith.mulf %0, %9 : vector<8x16x128xf32>
    %11 = vector.broadcast %4 : vector<1x16x128xf32> to vector<8x16x128xf32>
    %12 = arith.mulf %7, %11 : vector<8x16x128xf32>
    %13 = arith.addf %10, %12 : vector<8x16x128xf32>
    %14 = vector.broadcast %6 : vector<1x16x128xf32> to vector<8x16x128xf32>
    %15 = arith.mulf %8, %14 : vector<8x16x128xf32>
    %16 = arith.addf %13, %15 : vector<8x16x128xf32>
    %c0_8 = arith.constant 0 : index
    %c0_9 = arith.constant 0 : index
    %c0_10 = arith.constant 0 : index
    %17 = vector.load %arg6[%c0_8, %c0_9, %c0_10] : memref<8x16x128xf32, #tpu.memory_space<vmem>>, vector<8x16x128xf32>
    tpu.vector_store %arg6[%c0_8, %c0_9, %c0_10], %16 {strides = array<i32>} : memref<8x16x128xf32, #tpu.memory_space<vmem>>, vector<8x16x128xf32>,
    return
  }
  func.func @transform_0(%arg0: i32, %arg1: i32) -> (i32, i32, i32) {
    %c0_i32 = arith.constant 0 : i32
    %c0_i32_0 = arith.constant 0 : i32
    return %arg1, %arg0, %c0_i32 : i32, i32, i32
  }
  func.func @transform_1(%arg0: i32, %arg1: i32) -> (i32, i32) {
    %c0_i32 = arith.constant 0 : i32
    %c0_i32_0 = arith.constant 0 : i32
    return %arg0, %c0_i32 : i32, i32
  }
  func.func @transform_2(%arg0: i32, %arg1: i32) -> (i32, i32) {
    %c0_i32 = arith.constant 0 : i32
    %c0_i32_0 = arith.constant 0 : i32
    return %arg0, %c0_i32 : i32, i32
  }
  func.func @transform_3(%arg0: i32, %arg1: i32) -> (i32, i32) {
    %c0_i32 = arith.constant 0 : i32
    %c0_i32_0 = arith.constant 0 : i32
    return %arg0, %c0_i32 : i32, i32
  }
  func.func @transform_4(%arg0: i32, %arg1: i32) -> (i32, i32, i32) {
    %c0_i32 = arith.constant 0 : i32
    %c0_i32_0 = arith.constant 0 : i32
    return %arg1, %arg0, %c0_i32 : i32, i32, i32
  }
}

</mosaic_0001>

<bundles_post_ra>
// kernel: rope_forward.1
= control target key start
LH: loop header
LB: loop body
LE: loop exit
PB: predicated region body
PF: predicated region fallthrough
CT: control target
= control target key end

     0   :  { %9 = vsyncpa [#allocation3], 0  ;;  %s682_s0 = inlined_call_operand.hbm [shape: f32[8,16,128], index: 0, kind: input, shape index: {}]   ;;  %s683_s1 = inlined_call_operand.hbm [shape: f32[16,128], index: 1, kind: input, shape index: {}]   ;;  %s684_s2 = inlined_call_operand.hbm [shape: f32[16,128], index: 2, kind: input, shape index: {}]   ;;  %s685_s3 = inlined_call_operand.hbm [shape: f32[16,128], index: 3, kind: input, shape index: {}]   ;;  %s686_s4 = inlined_call_operand.hbm [shape: f32[8,16,128], index: 4, kind: output, shape index: {}]  }
   0x1   :  { %10 = vsyncpa [#allocation6], 0 }
   0x2   :  { %11 = vsyncpa [#allocation9], 0 }
   0x3   :  { %12 = vsyncpa [#allocation4], 0  ;;  %s401_s15 = smov [#allocation5]   ;;  %s402_s17 = smov [#allocation2]  }
   0x4   :  { %s30_s16 = sshll.u32 %s401_s15, 4  ;;  %s18_s18 = sshll.u32 %s402_s17, 4  ;;  %s31_s16 = int_to_ptr.vmem [resolvable:$true] %s30_s16  ;;  %s435_s18 = int_to_ptr.vmem [resolvable:$true] %s18_s18 }
   0x5   :  { %s283_s21 = scalar_lea.hbm %s683_s1, 256 }
   0x6   :  { %p284_p0 = scmp.ne.s32.totalorder %s683_s1, %s283_s21  ;;  %p287_p1 = scmp.lt.u32.totalorder %s283_s21, %s683_s1 }
   0x8   :  { %p289_p2 = pnand %p287_p1, %p284_p0 }
   0xa   :  { %292 = shalt.err (!%p289_p2)
}
   0xb   :  { %s293_s26 = scalar_lea.vmem %s31_s16, 256  ;;  %p298_p4 = scmp.lt.s32.totalorder %s31_s16, %s31_s16 }
   0xc   :  { %p294_p3 = scmp.ne.s32.totalorder %s31_s16, %s293_s26  ;;  %p299_p5 = scmp.lt.s32.totalorder %s293_s26, %s293_s26 }
   0xe   :  { %p300_p6 = por %p299_p5, %p298_p4 }
  0x10   :  { %p301_p7 = pnand %p300_p6, %p294_p3 }
  0x12   :  { %304 = shalt.err (!%p301_p7)
}
  0x13   :  { %s403_s27 = smov 128   ;;  %s404_s28 = smov 8  }
  0x14   :  { %36 = dma.hbm_to_vmem [thread:$0]  %s683_s1, 256, %s31_s16, [#allocation6], %s403_s27, %s403_s27, %s404_s28  }
  0x15   :  { %s305_s7 = scalar_lea.hbm %s682_s0, 2048 }
  0x16   :  { %p306_p8 = scmp.ne.s32.totalorder %s682_s0, %s305_s7  ;;  %p309_p9 = scmp.lt.u32.totalorder %s305_s7, %s682_s0 }
  0x18   :  { %p311_p10 = pnand %p309_p9, %p306_p8 }
  0x1a   :  { %314 = shalt.err (!%p311_p10)
}
  0x1b   :  { %s315_s12 = scalar_lea.vmem %s435_s18, 2048  ;;  %p320_p12 = scmp.lt.s32.totalorder %s435_s18, %s435_s18 }
  0x1c   :  { %p316_p11 = scmp.ne.s32.totalorder %s435_s18, %s315_s12  ;;  %p321_p13 = scmp.lt.s32.totalorder %s315_s12, %s315_s12 }
  0x1e   :  { %p322_p0 = por %p321_p13, %p320_p12 }
  0x20   :  { %p323_p1 = pnand %p322_p0, %p316_p11 }
  0x22   :  { %326 = shalt.err (!%p323_p1)
}
  0x23   :  { %24 = dma.hbm_to_vmem [thread:$0]  %s682_s0, 2048, %s435_s18, [#allocation3], %s403_s27, %s403_s27, %s404_s28  }
  0x24   :  { %s405_s14 = smov [#allocation7]   ;;  %s406_s16 = smov [#allocation8]  }
  0x25   :  { %s42_s15 = sshll.u32 %s405_s14, 4  ;;  %s54_s17 = sshll.u32 %s406_s16, 4  ;;  %s43_s15 = int_to_ptr.vmem [resolvable:$true] %s42_s15  ;;  %s472_s17 = int_to_ptr.vmem [resolvable:$true] %s54_s17 }
  0x26   :  { %s327_s21 = scalar_lea.hbm %s684_s2, 256 }
  0x27   :  { %p328_p2 = scmp.ne.s32.totalorder %s684_s2, %s327_s21  ;;  %p331_p3 = scmp.lt.u32.totalorder %s327_s21, %s684_s2 }
  0x29   :  { %p333_p4 = pnand %p331_p3, %p328_p2 }
  0x2b   :  { %336 = shalt.err (!%p333_p4)
}
  0x2c   :  { %s337_s0 = scalar_lea.vmem %s43_s15, 256  ;;  %p342_p6 = scmp.lt.s32.totalorder %s43_s15, %s43_s15 }
  0x2d   :  { %p338_p5 = scmp.ne.s32.totalorder %s43_s15, %s337_s0  ;;  %p343_p7 = scmp.lt.s32.totalorder %s337_s0, %s337_s0 }
  0x2f   :  { %p344_p8 = por %p343_p7, %p342_p6 }
  0x31   :  { %p345_p9 = pnand %p344_p8, %p338_p5 }
  0x33   :  { %348 = shalt.err (!%p345_p9)
}
  0x34   :  { %48 = dma.hbm_to_vmem [thread:$0]  %s684_s2, 256, %s43_s15, [#allocation6], %s403_s27, %s403_s27, %s404_s28  }
  0x35   :  { %s349_s5 = scalar_lea.hbm %s685_s3, 256 }
  0x36   :  { %p350_p10 = scmp.ne.s32.totalorder %s685_s3, %s349_s5  ;;  %p353_p11 = scmp.lt.u32.totalorder %s349_s5, %s685_s3 }
  0x38   :  { %p355_p12 = pnand %p353_p11, %p350_p10 }
  0x3a   :  { %358 = shalt.err (!%p355_p12)
}
  0x3b   :  { %s359_s10 = scalar_lea.vmem %s472_s17, 256  ;;  %p364_p0 = scmp.lt.s32.totalorder %s472_s17, %s472_s17 }
  0x3c   :  { %p360_p13 = scmp.ne.s32.totalorder %s472_s17, %s359_s10  ;;  %p365_p1 = scmp.lt.s32.totalorder %s359_s10, %s359_s10 }
  0x3e   :  { %p366_p2 = por %p365_p1, %p364_p0 }
  0x40   :  { %p367_p3 = pnand %p366_p2, %p360_p13 }
  0x42   :  { %370 = shalt.err (!%p367_p3)
}
  0x43   :  { %60 = dma.hbm_to_vmem [thread:$0]  %s685_s3, 256, %s472_s17, [#allocation9], %s403_s27, %s403_s27, %s404_s28  }
  0x44   :  { %393 = dma.done.wait [#allocation3], 2048  }
  0x45   :  { %394 = vsyncadd [#allocation3], 4294965248 }
  0x46   :  { %395 = dma.done.wait [#allocation6], 512  }
  0x47   :  { %396 = vsyncadd [#allocation6], 4294966784 }
  0x48   :  { %397 = dma.done.wait [#allocation9], 256  }
  0x49   :  { %398 = vsyncadd [#allocation9], 4294967040  ;;  %v509_v0 = vld [vmem:[#allocation2 + $0x10] sm:$0xff]  ;;  %v511_v1 = vld [vmem:[#allocation2] sm:$0xff]  ;;  %s407_s12 = smov 127   ;;  %s408_s3 = smov 1  }
  0x4a   :  { %99 = vrot.lane.b32.xlu1 %v509_v0, %s407_s12  ;;  %95 = vrot.lane.b32.xlu0 %v511_v1, %s407_s12  ;;  %v515_v2 = vld [vmem:[#allocation2 + $0x18] sm:$0xff]  ;;  %v517_v3 = vld [vmem:[#allocation2 + $0x8] sm:$0xff]  ;;  %v523_v5 = vld [vmem:[#allocation2 + $0x20] sm:$0xff]  ;;  %s409_s1 = smov [#allocation10]  }
  0x4b   :  { %v521_v4 = vld [vmem:[#allocation2 + $0x28] sm:$0xff]  ;;  %v527_v6 = vld [vmem:[#allocation2 + $0x38] sm:$0xff]  ;;  %v529_v7 = vld [vmem:[#allocation2 + $0x30] sm:$0xff]  ;;  %s260_s13 = sshll.u32 %s409_s1, 4  ;;  %s261_s13 = int_to_ptr.vmem [resolvable:$true] %s260_s13 }
  0x4c   :  { %v533_v8 = vld [vmem:[#allocation2 + $0x48] sm:$0xff]  ;;  %v535_v9 = vld [vmem:[#allocation2 + $0x40] sm:$0xff]  ;;  %v539_v10 = vld [vmem:[#allocation2 + $0x58] sm:$0xff]  ;;  %s371_s14 = scalar_lea.vmem %s261_s13, 2048  ;;  %p376_p5 = scmp.lt.s32.totalorder %s261_s13, %s261_s13 }
  0x4d   :  { %v541_v11 = vld [vmem:[#allocation2 + $0x50] sm:$0xff]  ;;  %v545_v12 = vld [vmem:[#allocation2 + $0x68] sm:$0xff]  ;;  %v547_v13 = vld [vmem:[#allocation2 + $0x60] sm:$0xff]  ;;  %p372_p4 = scmp.ne.s32.totalorder %s261_s13, %s371_s14  ;;  %p377_p6 = scmp.lt.s32.totalorder %s371_s14, %s371_s14 }
  0x4e   :  { %101 = vrot.lane.b32.xlu1 %v515_v2, %s407_s12  ;;  %97 = vrot.lane.b32.xlu0 %v517_v3, %s407_s12  ;;  %v551_v14 = vld [vmem:[#allocation2 + $0x78] sm:$0xff]  ;;  %v553_v15 = vld [vmem:[#allocation2 + $0x70] sm:$0xff]  ;;  %v581_v30 = vld [vmem:[#allocation5] sm:$0xff] }
  0x4f   :  { %v583_v31 = vld [vmem:[#allocation7] sm:$0xff]  ;;  %v585_v32 = vld [vmem:[#allocation5 + $0x8] sm:$0xff]  ;;  %v587_v33 = vld [vmem:[#allocation7 + $0x8] sm:$0xff]  ;;  %v159_v34 = vmul.f32 %v581_v30, %v511_v1  ;;  %v161_v42 = vmul.f32 %v581_v30, %v509_v0  ;;  %v163_v55 = vmul.f32 %v581_v30, %v523_v5  ;;  %p378_p7 = por %p377_p6, %p376_p5 }
  0x50   :  { %v160_v38 = vmul.f32 %v585_v32, %v517_v3  ;;  %v599_v40 = vld [vmem:[#allocation8 + $0x8] sm:$0xff]  ;;  %v601_v41 = vld [vmem:[#allocation8] sm:$0xff]  ;;  %v162_v43 = vmul.f32 %v585_v32, %v515_v2  ;;  %v164_v54 = vmul.f32 %v585_v32, %v521_v4 }
  0x51   :  { %p379_p8 = pnand %p378_p7, %p372_p4 }
  0x52   :  { %105 = vrot.lane.b32.xlu1 %v521_v4, %s407_s12  ;;  %103 = vrot.lane.b32.xlu0 %v523_v5, %s407_s12 }
  0x56   :  { %109 = vrot.lane.b32.xlu1 %v527_v6, %s407_s12  ;;  %107 = vrot.lane.b32.xlu0 %v529_v7, %s407_s12 }
  0x5a   :  { %113 = vrot.lane.b32.xlu1 %v533_v8, %s407_s12  ;;  %111 = vrot.lane.b32.xlu0 %v535_v9, %s407_s12 }
  0x5e   :  { %117 = vrot.lane.b32.xlu1 %v539_v10, %s407_s12  ;;  %115 = vrot.lane.b32.xlu0 %v541_v11, %s407_s12 }
  0x62   :  { %121 = vrot.lane.b32.xlu1 %v545_v12, %s407_s12  ;;  %119 = vrot.lane.b32.xlu0 %v547_v13, %s407_s12 }
  0x66   :  { %125 = vrot.lane.b32.xlu1 %v551_v14, %s407_s12  ;;  %123 = vrot.lane.b32.xlu0 %v553_v15, %s407_s12 }
  0x6a   :  { %129 = vrot.lane.b32.xlu1 %v517_v3, %s408_s3  ;;  %127 = vrot.lane.b32.xlu0 %v511_v1, %s408_s3  ;;  %v165_v3 = vmul.f32 %v581_v30, %v529_v7 }
  0x6e   :  { %133 = vrot.lane.b32.xlu1 %v515_v2, %s408_s3  ;;  %131 = vrot.lane.b32.xlu0 %v509_v0, %s408_s3  ;;  %v166_v2 = vmul.f32 %v585_v32, %v527_v6 }
  0x72   :  { %137 = vrot.lane.b32.xlu1 %v521_v4, %s408_s3  ;;  %135 = vrot.lane.b32.xlu0 %v523_v5, %s408_s3 }
  0x76   :  { %141 = vrot.lane.b32.xlu1 %v527_v6, %s408_s3  ;;  %139 = vrot.lane.b32.xlu0 %v529_v7, %s408_s3  ;;  %v168_v6 = vmul.f32 %v585_v32, %v533_v8  ;;  %v167_v7 = vmul.f32 %v581_v30, %v535_v9 }
  0x7a   :  { %145 = vrot.lane.b32.xlu1 %v533_v8, %s408_s3  ;;  %143 = vrot.lane.b32.xlu0 %v535_v9, %s408_s3  ;;  %v170_v8 = vmul.f32 %v585_v32, %v539_v10  ;;  %v169_v9 = vmul.f32 %v581_v30, %v541_v11 }
  0x7e   :  { %149 = vrot.lane.b32.xlu1 %v539_v10, %s408_s3  ;;  %147 = vrot.lane.b32.xlu0 %v541_v11, %s408_s3  ;;  %v172_v11 = vmul.f32 %v585_v32, %v545_v12 }
  0x82   :  { %153 = vrot.lane.b32.xlu1 %v545_v12, %s408_s3  ;;  %151 = vrot.lane.b32.xlu0 %v547_v13, %s408_s3 }
  0x86   :  { %157 = vrot.lane.b32.xlu1 %v551_v14, %s408_s3  ;;  %155 = vrot.lane.b32.xlu0 %v553_v15, %s408_s3 }
  0xbc   :  { %v100_v16 = vpop.permute.xlu1 %99  ;;  %v96_v17 = vpop.permute.xlu0 %95 }
  0xbd   :  { %v175_v35 = vmul.f32 %v96_v17, %v583_v31  ;;  %v177_v44 = vmul.f32 %v100_v16, %v583_v31 }
  0xbf   :  { %v191_v45 = vadd.f32 %v175_v35, %v159_v34  ;;  %v193_v60 = vadd.f32 %v177_v44, %v161_v42 }
  0xc0   :  { %v102_v18 = vpop.permute.xlu1 %101  ;;  %v98_v19 = vpop.permute.xlu0 %97 }
  0xc1   :  { %v176_v39 = vmul.f32 %v98_v19, %v587_v33  ;;  %v178_v48 = vmul.f32 %v102_v18, %v587_v33 }
  0xc3   :  { %v192_v49 = vadd.f32 %v176_v39, %v160_v38  ;;  %v194_v61 = vadd.f32 %v178_v48, %v162_v43 }
  0xc4   :  { %v106_v20 = vpop.permute.xlu1 %105  ;;  %v104_v21 = vpop.permute.xlu0 %103 }
  0xc5   :  { %v180_v56 = vmul.f32 %v106_v20, %v587_v33  ;;  %v179_v57 = vmul.f32 %v104_v21, %v583_v31 }
  0xc7   :  { %v196_v4 = vadd.f32 %v180_v56, %v164_v54  ;;  %v195_v5 = vadd.f32 %v179_v57, %v163_v55  ;;  %v171_v55 = vmul.f32 %v581_v30, %v547_v13  ;;  %v174_v13 = vmul.f32 %v585_v32, %v551_v14 }
  0xc8   :  { %v110_v22 = vpop.permute.xlu1 %109  ;;  %v108_v23 = vpop.permute.xlu0 %107 }
  0xc9   :  { %v182_v18 = vmul.f32 %v110_v22, %v587_v33  ;;  %v181_v19 = vmul.f32 %v108_v23, %v583_v31 }
  0xcb   :  { %v198_v42 = vadd.f32 %v182_v18, %v166_v2  ;;  %v197_v43 = vadd.f32 %v181_v19, %v165_v3 }
  0xcc   :  { %v114_v24 = vpop.permute.xlu1 %113  ;;  %v112_v25 = vpop.permute.xlu0 %111 }
  0xcd   :  { %v184_v38 = vmul.f32 %v114_v24, %v587_v33  ;;  %v183_v22 = vmul.f32 %v112_v25, %v583_v31 }
  0xcf   :  { %v200_v24 = vadd.f32 %v184_v38, %v168_v6  ;;  %v199_v25 = vadd.f32 %v183_v22, %v167_v7 }
  0xd0   :  { %v573_v26 = vpop.permute.xlu1 %117  ;;  %v575_v27 = vpop.permute.xlu0 %115 }
  0xd4   :  { %v577_v28 = vpop.permute.xlu1 %121  ;;  %v579_v29 = vpop.permute.xlu0 %119 }
  0xd8   :  { %v592_v36 = vpop.permute.xlu1 %125  ;;  %v594_v37 = vpop.permute.xlu0 %123 }
  0xd9   :  { %v190_v2 = vmul.f32 %v592_v36, %v587_v33  ;;  %v189_v3 = vmul.f32 %v594_v37, %v583_v31 }
  0xdc   :  { %v130_v46 = vpop.permute.xlu1 %129  ;;  %v128_v47 = vpop.permute.xlu0 %127 }
  0xdd   :  { %v208_v50 = vmul.f32 %v130_v46, %v599_v40  ;;  %v207_v51 = vmul.f32 %v128_v47, %v601_v41 }
  0xdf   :  { %v224_v52 = vadd.f32 %v208_v50, %v192_v49  ;;  %v223_v53 = vadd.f32 %v207_v51, %v191_v45  ;;  %v186_v50 = vmul.f32 %v573_v26, %v587_v33  ;;  %v185_v51 = vmul.f32 %v575_v27, %v583_v31 }
  0xe0   :  { %v134_v58 = vpop.permute.xlu1 %133  ;;  %v132_v59 = vpop.permute.xlu0 %131  ;;  %v188_v26 = vmul.f32 %v577_v28, %v587_v33  ;;  %v187_v27 = vmul.f32 %v579_v29, %v583_v31  ;;  %v173_v28 = vmul.f32 %v581_v30, %v553_v15  ;;  %v206_v30 = vadd.f32 %v190_v2, %v174_v13 }
  0xe1   :  { %240 = vst [vmem:[#allocation10 + $0x8] sm:$0xff] %v224_v52  ;;  %239 = vst [vmem:[#allocation10] sm:$0xff] %v223_v53  ;;  %v210_v62 = vmul.f32 %v134_v58, %v599_v40  ;;  %v209_v63 = vmul.f32 %v132_v59, %v601_v41  ;;  %v202_v58 = vadd.f32 %v186_v50, %v170_v8 }
  0xe2   :  { %v201_v59 = vadd.f32 %v185_v51, %v169_v9  ;;  %v203_v29 = vadd.f32 %v187_v27, %v171_v55 }
  0xe3   :  { %v226_v0 = vadd.f32 %v210_v62, %v194_v61  ;;  %v225_v1 = vadd.f32 %v209_v63, %v193_v60  ;;  %v204_v63 = vadd.f32 %v188_v26, %v172_v11 }
  0xe4   :  { %v138_v16 = vpop.permute.xlu1 %137  ;;  %v136_v17 = vpop.permute.xlu0 %135 }
  0xe5   :  { %242 = vst [vmem:[#allocation10 + $0x18] sm:$0xff] %v226_v0  ;;  %241 = vst [vmem:[#allocation10 + $0x10] sm:$0xff] %v225_v1  ;;  %v212_v20 = vmul.f32 %v138_v16, %v599_v40  ;;  %v211_v21 = vmul.f32 %v136_v17, %v601_v41  ;;  %v205_v17 = vadd.f32 %v189_v3, %v173_v28 }
  0xe7   :  { %v228_v34 = vadd.f32 %v212_v20, %v196_v4  ;;  %v227_v35 = vadd.f32 %v211_v21, %v195_v5 }
  0xe8   :  { %v142_v39 = vpop.permute.xlu1 %141  ;;  %v140_v23 = vpop.permute.xlu0 %139 }
  0xe9   :  { %244 = vst [vmem:[#allocation10 + $0x28] sm:$0xff] %v228_v34  ;;  %243 = vst [vmem:[#allocation10 + $0x20] sm:$0xff] %v227_v35  ;;  %v214_v44 = vmul.f32 %v142_v39, %v599_v40  ;;  %v213_v45 = vmul.f32 %v140_v23, %v601_v41 }
  0xeb   :  { %v230_v46 = vadd.f32 %v214_v44, %v198_v42  ;;  %v229_v47 = vadd.f32 %v213_v45, %v197_v43 }
  0xec   :  { %v146_v48 = vpop.permute.xlu1 %145  ;;  %v144_v49 = vpop.permute.xlu0 %143 }
  0xed   :  { %246 = vst [vmem:[#allocation10 + $0x38] sm:$0xff] %v230_v46  ;;  %245 = vst [vmem:[#allocation10 + $0x30] sm:$0xff] %v229_v47  ;;  %v216_v52 = vmul.f32 %v146_v48, %v599_v40  ;;  %v215_v53 = vmul.f32 %v144_v49, %v601_v41 }
  0xef   :  { %v232_v10 = vadd.f32 %v216_v52, %v200_v24  ;;  %v231_v54 = vadd.f32 %v215_v53, %v199_v25 }
  0xf0   :  { %v150_v56 = vpop.permute.xlu1 %149  ;;  %v148_v57 = vpop.permute.xlu0 %147 }
  0xf1   :  { %248 = vst [vmem:[#allocation10 + $0x48] sm:$0xff] %v232_v10  ;;  %247 = vst [vmem:[#allocation10 + $0x40] sm:$0xff] %v231_v54  ;;  %v218_v60 = vmul.f32 %v150_v56, %v599_v40  ;;  %v217_v61 = vmul.f32 %v148_v57, %v601_v41 }
  0xf3   :  { %v234_v12 = vadd.f32 %v218_v60, %v202_v58  ;;  %v233_v62 = vadd.f32 %v217_v61, %v201_v59 }
  0xf4   :  { %v154_v0 = vpop.permute.xlu1 %153  ;;  %v152_v1 = vpop.permute.xlu0 %151 }
  0xf5   :  { %250 = vst [vmem:[#allocation10 + $0x58] sm:$0xff] %v234_v12  ;;  %249 = vst [vmem:[#allocation10 + $0x50] sm:$0xff] %v233_v62  ;;  %v220_v4 = vmul.f32 %v154_v0, %v599_v40  ;;  %v219_v5 = vmul.f32 %v152_v1, %v601_v41 }
  0xf7   :  { %v236_v14 = vadd.f32 %v220_v4, %v204_v63  ;;  %v235_v32 = vadd.f32 %v219_v5, %v203_v29 }
  0xf8   :  { %v158_v16 = vpop.permute.xlu1 %157  ;;  %v156_v15 = vpop.permute.xlu0 %155 }
  0xf9   :  { %252 = vst [vmem:[#allocation10 + $0x68] sm:$0xff] %v236_v14  ;;  %251 = vst [vmem:[#allocation10 + $0x60] sm:$0xff] %v235_v32  ;;  %v222_v33 = vmul.f32 %v158_v16, %v599_v40  ;;  %v221_v31 = vmul.f32 %v156_v15, %v601_v41 }
  0xfb   :  { %v238_v36 = vadd.f32 %v222_v33, %v206_v30  ;;  %v237_v37 = vadd.f32 %v221_v31, %v205_v17 }
  0xfd   :  { %254 = vst [vmem:[#allocation10 + $0x78] sm:$0xff] %v238_v36  ;;  %253 = vst [vmem:[#allocation10 + $0x70] sm:$0xff] %v237_v37 }
  0xfe   :  { %382 = shalt.err (!%p379_p8)
}
  0xff   :  { %s383_s17 = scalar_lea.hbm %s686_s4, 2048 }
 0x100   :  { %p384_p9 = scmp.ne.s32.totalorder %s686_s4, %s383_s17  ;;  %p387_p10 = scmp.lt.u32.totalorder %s383_s17, %s686_s4 }
 0x102   :  { %p389_p11 = pnand %p387_p10, %p384_p9 }
 0x104   :  { %392 = shalt.err (!%p389_p11)
}
 0x105   :  { %266 = dma.vmem_to_hbm [thread:$0]  %s261_s13, 2048, %s686_s4, [#allocation4], %s403_s27, %s403_s27, %s404_s28  }
 0x106   :  { %399 = dma.done.wait [#allocation4], 2048  }
 0x107   :  { %400 = vsyncadd [#allocation4], 4294965248 }
 0x108   :  { %270 = vsyncpa [#allocation3], 1 }
 0x109   :  { %271 = vsyncpa [#allocation6], 1 }
 0x10a   :  { %272 = vsyncpa [#allocation9], 1 }
 0x10b   :  { %273 = vsyncpa [#allocation4], 1 }

</bundles_post_ra>
